<compile_context>
chip_gen: v7x
topology: tpu7x:2x2x1
jax: 0.10.0
libtpu: 0.0.40
codegen_flags: <defaults>
</compile_context>

<pallas_src>
import functools

import jax
import jax.numpy as jnp
from jax.experimental import pallas as pl
from jax.experimental.pallas import tpu as pltpu

D_IN, D_H1, D_H2, D_OUT = 60, 50, 50, 40
TILE_B_MAX = 4096           # rows per grid step
MIN_GRID_STEPS = 4          # keep >=2 steps per TensorCore on v7x for large B
LANE = 128


def _round_up(n, m):
    return ((n + m - 1) // m) * m


def _mlp_kernel(x_ref, w1_ref, b1_ref, w2_ref, b2_ref, w3_ref, b3_ref, o_ref):
    # fc1 + ReLU: MXU matmul with f32 accumulation; bias/ReLU on the VPU.
    h1 = jnp.dot(x_ref[...], w1_ref[...], preferred_element_type=jnp.float32)
    h1 = jnp.maximum(h1 + b1_ref[...], 0.0)
    # fc2 + ReLU (activations cast back to the weight compute dtype for the MXU).
    h2 = jnp.dot(h1.astype(w2_ref.dtype), w2_ref[...],
                 preferred_element_type=jnp.float32)
    h2 = jnp.maximum(h2 + b2_ref[...], 0.0)
    # fc3 (no activation).
    h3 = jnp.dot(h2.astype(w3_ref.dtype), w3_ref[...],
                 preferred_element_type=jnp.float32)
    o_ref[...] = (h3 + b3_ref[...]).astype(o_ref.dtype)


def prepare_params(params, compute_dtype=jnp.bfloat16):
    """One-time preprocessing: torch-layout (out, in) weights -> (in, out) in
    the compute dtype (default bf16), biases -> (1, N) float32 (applied after
    the f32-accumulated matmul). Do this once, outside the per-call path."""
    return dict(
        w1=params["w1"].T.astype(compute_dtype),   # (60, 50)
        w2=params["w2"].T.astype(compute_dtype),   # (50, 50)
        w3=params["w3"].T.astype(compute_dtype),   # (50, 40)
        b1=params["b1"].reshape(1, -1).astype(jnp.float32),
        b2=params["b2"].reshape(1, -1).astype(jnp.float32),
        b3=params["b3"].reshape(1, -1).astype(jnp.float32),
    )


@functools.partial(jax.jit, static_argnames=("tile_b", "out_dtype",
                                             "pad_out_lanes"))
def mlp_forward(x, prepped, tile_b=None, out_dtype=jnp.float32,
                pad_out_lanes=False):
    """x: (B, 60). prepped: output of prepare_params(). Returns (B, 40)."""
    B = x.shape[0]
    if tile_b is None:
        # Multiple of 8 (sublane), capped at TILE_B_MAX. Double-buffered
        # (tile, 128)-padded x (bf16) + out (f32) tiles at 4096 rows are only
        # ~6 MiB -> fits even v5e's default scoped VMEM with headroom.
        tile_b = min(TILE_B_MAX, _round_up(max(B, 1), 8))
        # For big batches keep >= MIN_GRID_STEPS grid steps so v7x's two
        # TensorCores each get >= 2 steps (megacore sharding + DMA/compute
        # overlap). Small batches stay single-step (grid loop is serial on
        # v5e/v6e, so extra steps there are pure overhead).
        if B >= MIN_GRID_STEPS * 1024:
            tile_b = min(tile_b, _round_up(pl.cdiv(B, MIN_GRID_STEPS), 8))
    b_padded = _round_up(B, tile_b)

    compute_dtype = prepped["w1"].dtype
    xc = x.astype(compute_dtype)
    if b_padded != B:
        xc = jnp.pad(xc, ((0, b_padded - B), (0, 0)))

    # Optional lane-dense output: pad fc3's output columns to 128 so the final
    # store is an unmasked vst and the VMEM->HBM writeback is dense. The MXU
    # pads N to 128 anyway, so the extra columns are free compute; the cost is
    # ~3.2x more output HBM write bytes (only worth it if the masked-store
    # path, not HBM, is binding — benchmark per generation).
    w3, b3 = prepped["w3"], prepped["b3"]
    d_out = D_OUT
    if pad_out_lanes:
        d_out = LANE
        w3 = jnp.pad(w3, ((0, 0), (0, LANE - D_OUT)))
        b3 = jnp.pad(b3, ((0, 0), (0, LANE - D_OUT)))

    grid = (b_padded // tile_b,)
    x_spec = pl.BlockSpec((tile_b, D_IN), lambda i: (i, 0))
    out_spec = pl.BlockSpec((tile_b, d_out), lambda i: (i, 0))
    # Weights / biases: constant index_map -> same block every grid step, so
    # they stay VMEM-resident (no re-DMA). Combined footprint < 100 KiB.
    pinned = lambda shape: pl.BlockSpec(shape, lambda i: (0, 0))

    out = pl.pallas_call(
        _mlp_kernel,
        out_shape=jax.ShapeDtypeStruct((b_padded, d_out), out_dtype),
        grid=grid,
        in_specs=[
            x_spec,
            pinned(prepped["w1"].shape), pinned(prepped["b1"].shape),
            pinned(prepped["w2"].shape), pinned(prepped["b2"].shape),
            pinned(w3.shape), pinned(b3.shape),
        ],
        out_specs=out_spec,
        compiler_params=pltpu.CompilerParams(
            # Batch axis is embarrassingly parallel -> shards across both TCs
            # on v7x (no-op on single-TC v5e/v6e).
            dimension_semantics=("parallel",),
            # Explicit scoped-VMEM budget: plenty for the ~6-8 MiB working set
            # at TILE_B_MAX and safe on v5e (128 MiB phys) and v7x (64 MiB).
            vmem_limit_bytes=32 * 1024 * 1024,
        ),
    )(xc, prepped["w1"], prepped["b1"], prepped["w2"], prepped["b2"], w3, b3)

    return out[:B, :D_OUT]


def init_params(key):
    """Deterministic init mimicking torch.nn.Linear default U(-1/sqrt(fan_in), +)."""
    def linear(key, fan_in, fan_out):
        kw, kb = jax.random.split(key)
        bound = 1.0 / jnp.sqrt(float(fan_in))
        w = jax.random.uniform(kw, (fan_out, fan_in), jnp.float32, -bound, bound)
        b = jax.random.uniform(kb, (fan_out,), jnp.float32, -bound, bound)
        return w, b

    k1, k2, k3 = jax.random.split(key, 3)
    w1, b1 = linear(k1, D_IN, D_H1)
    w2, b2 = linear(k2, D_H1, D_H2)
    w3, b3 = linear(k3, D_H2, D_OUT)
    return {"w1": w1, "b1": b1, "w2": w2, "b2": b2, "w3": w3, "b3": b3}


def reference_forward(x, p):
    h = jnp.maximum(x @ p["w1"].T + p["b1"], 0.0)
    h = jnp.maximum(h @ p["w2"].T + p["b2"], 0.0)
    return h @ p["w3"].T + p["b3"]


if __name__ == "__main__":
    key = jax.random.PRNGKey(0)
    kx, kp, kx2 = jax.random.split(key, 3)
    params = init_params(kp)

    prepped_bf16 = prepare_params(params)                              # default bf16 compute
    prepped_f32 = prepare_params(params, compute_dtype=jnp.float32)    # f32 numerics path

    # Small-batch check (single grid step; default bf16 compute path).
    B_small = 8
    x_small = jax.random.normal(kx, (B_small, D_IN), jnp.float32)
    ref_small = reference_forward(x_small, params)
    out_small = jax.block_until_ready(mlp_forward(x_small, prepped_bf16))
    assert out_small.shape == (B_small, D_OUT), out_small.shape
    assert jnp.allclose(out_small, ref_small, atol=2e-1, rtol=5e-2), \
        "bf16 small-batch mismatch vs reference"

    # f32-compute path: tighter tolerance (still not bit-exact on the MXU).
    out_small_f32 = jax.block_until_ready(mlp_forward(x_small, prepped_f32))
    assert jnp.allclose(out_small_f32, ref_small, atol=1e-4, rtol=1e-4), \
        "f32 small-batch mismatch vs reference"

    # Multi-tile check: small tile_b override to exercise grid > 1 and tail
    # padding (600 rows -> 3 tiles of 256, last one padded).
    B_multi = 600
    x_multi = jax.random.normal(kx2, (B_multi, D_IN), jnp.float32)
    ref_multi = reference_forward(x_multi, params)
    out_multi = jax.block_until_ready(
        mlp_forward(x_multi, prepped_bf16, tile_b=256))
    assert out_multi.shape == (B_multi, D_OUT), out_multi.shape
    assert jnp.allclose(out_multi, ref_multi, atol=2e-1, rtol=5e-2), \
        "bf16 multi-tile mismatch vs reference"

    # Lane-dense-output option (padded to 128 lanes, sliced back to 40).
    out_padded = jax.block_until_ready(
        mlp_forward(x_multi, prepped_bf16, tile_b=256, pad_out_lanes=True))
    assert out_padded.shape == (B_multi, D_OUT), out_padded.shape
    assert jnp.allclose(out_padded, out_multi, atol=1e-5, rtol=1e-5), \
        "pad_out_lanes path mismatch vs unpadded path"

    print("KERNEL_OK")
</pallas_src>

<mosaic_0001>
module attributes {stable_mosaic.version = 11 : i64} {
  func.func @_mlp_kernel(%arg0: i32, %arg1: memref<8x60xbf16, #tpu.memory_space<vmem>>, %arg2: memref<60x50xbf16, #tpu.memory_space<vmem>>, %arg3: memref<1x50xf32, #tpu.memory_space<vmem>>, %arg4: memref<50x50xbf16, #tpu.memory_space<vmem>>, %arg5: memref<1x50xf32, #tpu.memory_space<vmem>>, %arg6: memref<50x40xbf16, #tpu.memory_space<vmem>>, %arg7: memref<1x40xf32, #tpu.memory_space<vmem>>, %arg8: memref<8x40xf32, #tpu.memory_space<vmem>>) attributes {dimension_semantics = [#tpu.dimension_semantics<parallel>], iteration_bounds = array<i64: 1>, scalar_prefetch = 0 : i64, scratch_operands = 0 : i64, tpu.core_type = #tpu.core_type<tc>, window_params = [{transform_indices = @transform_0, window_bounds = array<i64: 8, 60>}, {pipeline_mode = #tpu.pipeline_mode<synchronous>, transform_indices = @transform_1, window_bounds = array<i64: 60, 50>}, {pipeline_mode = #tpu.pipeline_mode<synchronous>, transform_indices = @transform_2, window_bounds = array<i64: 1, 50>}, {pipeline_mode = #tpu.pipeline_mode<synchronous>, transform_indices = @transform_3, window_bounds = array<i64: 50, 50>}, {pipeline_mode = #tpu.pipeline_mode<synchronous>, transform_indices = @transform_4, window_bounds = array<i64: 1, 50>}, {pipeline_mode = #tpu.pipeline_mode<synchronous>, transform_indices = @transform_5, window_bounds = array<i64: 50, 40>}, {pipeline_mode = #tpu.pipeline_mode<synchronous>, transform_indices = @transform_6, window_bounds = array<i64: 1, 40>}, {transform_indices = @transform_7, window_bounds = array<i64: 8, 40>}]} {
    %c0 = arith.constant 0 : index
    %c0_0 = arith.constant 0 : index
    %0 = vector.load %arg1[%c0, %c0_0] : memref<8x60xbf16, #tpu.memory_space<vmem>>, vector<8x60xbf16>
    %c0_1 = arith.constant 0 : index
    %c0_2 = arith.constant 0 : index
    %1 = vector.load %arg2[%c0_1, %c0_2] : memref<60x50xbf16, #tpu.memory_space<vmem>>, vector<60x50xbf16>
    %cst = arith.constant dense<0.000000e+00> : vector<8x50xf32>
    %2 = tpu.matmul %0, %1, %cst {dimension_numbers = #tpu.dot_dimension_numbers<[1], [0], [0], [1], [0, 0, 1, 1], [], []>} : vector<8x60xbf16>, vector<60x50xbf16>, vector<8x50xf32> -> vector<8x50xf32>
    %c0_3 = arith.constant 0 : index
    %c0_4 = arith.constant 0 : index
    %3 = vector.load %arg3[%c0_3, %c0_4] : memref<1x50xf32, #tpu.memory_space<vmem>>, vector<1x50xf32>
    %4 = vector.broadcast %3 : vector<1x50xf32> to vector<8x50xf32>
    %5 = arith.addf %2, %4 : vector<8x50xf32>
    %cst_5 = arith.constant 0.000000e+00 : f32
    %6 = vector.broadcast %cst_5 : f32 to vector<8x50xf32>
    %7 = arith.maximumf %5, %6 : vector<8x50xf32>
    %8 = arith.truncf %7 : vector<8x50xf32> to vector<8x50xbf16>
    %c0_6 = arith.constant 0 : index
    %c0_7 = arith.constant 0 : index
    %9 = vector.load %arg4[%c0_6, %c0_7] : memref<50x50xbf16, #tpu.memory_space<vmem>>, vector<50x50xbf16>
    %cst_8 = arith.constant dense<0.000000e+00> : vector<8x50xf32>
    %10 = tpu.matmul %8, %9, %cst_8 {dimension_numbers = #tpu.dot_dimension_numbers<[1], [0], [0], [1], [0, 0, 1, 1], [], []>} : vector<8x50xbf16>, vector<50x50xbf16>, vector<8x50xf32> -> vector<8x50xf32>
    %c0_9 = arith.constant 0 : index
    %c0_10 = arith.constant 0 : index
    %11 = vector.load %arg5[%c0_9, %c0_10] : memref<1x50xf32, #tpu.memory_space<vmem>>, vector<1x50xf32>
    %12 = vector.broadcast %11 : vector<1x50xf32> to vector<8x50xf32>
    %13 = arith.addf %10, %12 : vector<8x50xf32>
    %cst_11 = arith.constant 0.000000e+00 : f32
    %14 = vector.broadcast %cst_11 : f32 to vector<8x50xf32>
    %15 = arith.maximumf %13, %14 : vector<8x50xf32>
    %16 = arith.truncf %15 : vector<8x50xf32> to vector<8x50xbf16>
    %c0_12 = arith.constant 0 : index
    %c0_13 = arith.constant 0 : index
    %17 = vector.load %arg6[%c0_12, %c0_13] : memref<50x40xbf16, #tpu.memory_space<vmem>>, vector<50x40xbf16>
    %cst_14 = arith.constant dense<0.000000e+00> : vector<8x40xf32>
    %18 = tpu.matmul %16, %17, %cst_14 {dimension_numbers = #tpu.dot_dimension_numbers<[1], [0], [0], [1], [0, 0, 1, 1], [], []>} : vector<8x50xbf16>, vector<50x40xbf16>, vector<8x40xf32> -> vector<8x40xf32>
    %c0_15 = arith.constant 0 : index
    %c0_16 = arith.constant 0 : index
    %19 = vector.load %arg7[%c0_15, %c0_16] : memref<1x40xf32, #tpu.memory_space<vmem>>, vector<1x40xf32>
    %20 = vector.broadcast %19 : vector<1x40xf32> to vector<8x40xf32>
    %21 = arith.addf %18, %20 : vector<8x40xf32>
    %c0_17 = arith.constant 0 : index
    %c0_18 = arith.constant 0 : index
    %22 = vector.load %arg8[%c0_17, %c0_18] : memref<8x40xf32, #tpu.memory_space<vmem>>, vector<8x40xf32>
    tpu.vector_store %arg8[%c0_17, %c0_18], %21 {strides = array<i32>} : memref<8x40xf32, #tpu.memory_space<vmem>>, vector<8x40xf32>,
    return
  }
  func.func @transform_0(%arg0: i32) -> (i32, i32) {
    %c0_i32 = arith.constant 0 : i32
    %c0_i32_0 = arith.constant 0 : i32
    return %arg0, %c0_i32 : i32, i32
  }
  func.func @transform_1(%arg0: i32) -> (i32, i32) {
    %c0_i32 = arith.constant 0 : i32
    %c0_i32_0 = arith.constant 0 : i32
    %c0_i32_1 = arith.constant 0 : i32
    return %c0_i32, %c0_i32_0 : i32, i32
  }
  func.func @transform_2(%arg0: i32) -> (i32, i32) {
    %c0_i32 = arith.constant 0 : i32
    %c0_i32_0 = arith.constant 0 : i32
    %c0_i32_1 = arith.constant 0 : i32
    return %c0_i32, %c0_i32_0 : i32, i32
  }
  func.func @transform_3(%arg0: i32) -> (i32, i32) {
    %c0_i32 = arith.constant 0 : i32
    %c0_i32_0 = arith.constant 0 : i32
    %c0_i32_1 = arith.constant 0 : i32
    return %c0_i32, %c0_i32_0 : i32, i32
  }
  func.func @transform_4(%arg0: i32) -> (i32, i32) {
    %c0_i32 = arith.constant 0 : i32
    %c0_i32_0 = arith.constant 0 : i32
    %c0_i32_1 = arith.constant 0 : i32
    return %c0_i32, %c0_i32_0 : i32, i32
  }
  func.func @transform_5(%arg0: i32) -> (i32, i32) {
    %c0_i32 = arith.constant 0 : i32
    %c0_i32_0 = arith.constant 0 : i32
    %c0_i32_1 = arith.constant 0 : i32
    return %c0_i32, %c0_i32_0 : i32, i32
  }
  func.func @transform_6(%arg0: i32) -> (i32, i32) {
    %c0_i32 = arith.constant 0 : i32
    %c0_i32_0 = arith.constant 0 : i32
    %c0_i32_1 = arith.constant 0 : i32
    return %c0_i32, %c0_i32_0 : i32, i32
  }
  func.func @transform_7(%arg0: i32) -> (i32, i32) {
    %c0_i32 = arith.constant 0 : i32
    %c0_i32_0 = arith.constant 0 : i32
    return %arg0, %c0_i32 : i32, i32
  }
}

</mosaic_0001>

<bundles_post_ra>
// kernel: mlp_forward.1
= control target key start
LH: loop header
LB: loop body
LE: loop exit
PB: predicated region body
PF: predicated region fallthrough
CT: control target
= control target key end

     0   :  { %v407_v1 = vmov 0.0   ;;  %vm408_vm0 = vmmov 0   ;;  %vm71_vm1 = vcmask 1045504   ;;  %s517_s0 = inlined_call_operand.vmem [shape: bf16[8,60], index: 0, kind: input, shape index: {}]   ;;  %s518_s1 = inlined_call_operand.vmem [shape: bf16[60,50], index: 1, kind: input, shape index: {}]   ;;  %s519_s2 = inlined_call_operand.vmem [shape: f32[1,50], index: 2, kind: input, shape index: {}]   ;;  %s520_s3 = inlined_call_operand.vmem [shape: bf16[50,50], index: 3, kind: input, shape index: {}]   ;;  %s521_s4 = inlined_call_operand.vmem [shape: f32[1,50], index: 4, kind: input, shape index: {}]   ;;  %s522_s5 = inlined_call_operand.vmem [shape: bf16[50,40], index: 5, kind: input, shape index: {}]   ;;  %s523_s6 = inlined_call_operand.vmem [shape: f32[1,40], index: 6, kind: input, shape index: {}]   ;;  %s524_s7 = inlined_call_operand.hbm [shape: f32[8,40], index: 7, kind: output, shape index: {}]  }
   0x1   :  { %v371_v0 = vld [vmem:[%s518_s1] sm:$0xff]   ;;  %332 = vmatprep.subr.bf16.mxu0 %v407_v1  ;;  %344 = vmatprep.subr.bf16.mxu1 %v407_v1  ;;  %v372_v2 = vld [vmem:[%s518_s1 + $0x8] sm:$0xff]   ;;  %v373_v3 = vld [vmem:[%s518_s1 + $0x10] sm:$0xff]  }
   0x2   :  { %333 = vmatpush3.bf16.msra.mxu0 %v371_v0  ;;  %340 = vmatprep.mubr.msk.bf16.mxu0 %vm408_vm0, %v407_v1  ;;  %v375_v4 = vld [vmem:[%s520_s3] sm:$0xff]   ;;  %v374_v5 = vld [vmem:[%s518_s1 + $0x18] sm:$0x3f]   ;;  %v376_v6 = vld [vmem:[%s520_s3 + $0x8] sm:$0xff]  }
   0x3   :  { %334 = vmatprep.subr.bf16.mxu0 %v407_v1  ;;  %352 = vmatprep.mubr.msk.bf16.mxu1 %vm408_vm0, %v407_v1 }
   0x4   :  { %345 = vmatpush3.bf16.msra.mxu1 %v375_v4 }
   0x5   :  { %346 = vmatprep.subr.bf16.mxu1 %v407_v1 }
   0x6   :  { %335 = vmatpush3.bf16.msra.mxu0 %v372_v2 }
   0x7   :  { %336 = vmatprep.subr.bf16.mxu0 %v407_v1 }
   0x8   :  { %347 = vmatpush3.bf16.msra.mxu1 %v376_v6 }
   0xa   :  { %337 = vmatpush3.bf16.msra.mxu0 %v373_v3 }
   0xb   :  { %12 = vsyncpa [#allocation3], 0  ;;  %338 = vmatprep.subr.bf16.mxu0 %v407_v1  ;;  %v73_v7 = vsel %vm71_vm1, %v374_v5, 0  ;;  %348 = vmatprep.subr.bf16.mxu1 %v407_v1  ;;  %v28_v8 = vld [vmem:[%s517_s0] sm:$0xf]  ;;  %vm67_vm2 = vcmask 490496  }
   0xc   :  { %v377_v9 = vld [vmem:[%s520_s3 + $0x10] sm:$0xff]   ;;  %v378_v10 = vld [vmem:[%s520_s3 + $0x18] ss:$0 sps:$4 sm:$0x11]   ;;  %vm156_vm3 = vcmask 1040384   ;;  %v379_v12 = vld [vmem:[%s522_s5] sm:$0xff]  }
   0xd   :  { %349 = vmatpush3.bf16.msra.mxu1 %v377_v9  ;;  %v158_v11 = vsel %vm156_vm3, %v378_v10, 0  ;;  %v380_v13 = vld [vmem:[%s522_s5 + $0x8] sm:$0xff]   ;;  %v299_v14 = vld [vmem:[%s519_s2] ss:$0 sm:$0xff]  ;;  %vm152_vm4 = vcmask 408576   ;;  %v381_v22 = vld [vmem:[%s522_s5 + $0x10] sm:$0xff]  }
   0xe   :  { %339 = vmatpush3.bf16.msra.mxu0 %v73_v7  ;;  %350 = vmatprep.subr.bf16.mxu1 %v407_v1  ;;  %v382_v23 = vld [vmem:[%s522_s5 + $0x18] ss:$0 sps:$4 sm:$0x11]   ;;  %v305_v25 = vld [vmem:[%s521_s4] ss:$0 sm:$0xff]  ;;  %s409_s5 = smov [#allocation2]  }
   0xf   :  { %356 = vmatprep.subr.bf16.mxu0 %v407_v1  ;;  %v241_v24 = vsel %vm156_vm3, %v382_v23, 0  ;;  %v311_v33 = vld [vmem:[%s523_s6] ss:$0 sm:$0xff]  ;;  %s291_s29 = sshll.u32 %s409_s5, 4  ;;  %vm283_vm5 = vcmask 326656   ;;  %s292_s29 = int_to_ptr.vmem [resolvable:$true] %s291_s29 }
  0x10   :  { %s383_s4 = scalar_lea.vmem %s292_s29, 128  ;;  %p388_p1 = scmp.lt.s32.totalorder %s292_s29, %s292_s29 }
  0x11   :  { %341 = vmatmul.mubr.msk.bf16.vlgmr.msra.gmra.mrb[0].mxu0 %vm67_vm2, %v28_v8  ;;  %351 = vmatpush3.bf16.msra.mxu1 %v158_v11  ;;  %p384_p0 = scmp.ne.s32.totalorder %s292_s29, %s383_s4  ;;  %p389_p2 = scmp.lt.s32.totalorder %s383_s4, %s383_s4 }
  0x12   :  { %364 = vmatprep.mubr.msk.bf16.mxu0 %vm408_vm0, %v407_v1  ;;  %357 = vmatpush3.bf16.msra.mxu0 %v379_v12 }
  0x13   :  { %358 = vmatprep.subr.bf16.mxu0 %v407_v1  ;;  %p390_p3 = por %p389_p2, %p388_p1 }
  0x15   :  { %p391_p4 = pnand %p390_p3, %p384_p0 }
  0x16   :  { %359 = vmatpush3.bf16.msra.mxu0 %v380_v13 }
  0x17   :  { %360 = vmatprep.subr.bf16.mxu0 %v407_v1 }
  0x1a   :  { %361 = vmatpush3.bf16.msra.mxu0 %v381_v22 }
  0x1b   :  { %362 = vmatprep.subr.bf16.mxu0 %v407_v1 }
  0x1e   :  { %363 = vmatpush3.bf16.msra.mxu0 %v241_v24 }
  0xe4   :  { %v109_v15 = vpop.f32.mrb[0].mxu0 }
  0xe5   :  { %v110_v16 = vadd.f32 %v299_v14, %v109_v15  ;;  %v342_v17 = vpop.f32.mrb[1].mxu0 }
  0xe6   :  { %v112_v18 = vpop.f32.mrb[2].mxu0 }
  0xe7   :  { %v115_v19 = vmax.f32 %v110_v16, 0.0  ;;  %v343_v20 = vpop.f32.mrb[3].mxu0 }
  0xe9   :  { %v116_v21 = vpack.c.bf16 %v115_v19, %v115_v19 }
  0xeb   :  { %353 = vmatmul.mubr.msk.bf16.vlgmr.msra.gmra.mrb[0].mxu1 %vm152_vm4, %v116_v21 }
 0x1be   :  { %v194_v26 = vpop.f32.mrb[0].mxu1 }
 0x1bf   :  { %v195_v27 = vadd.f32 %v305_v25, %v194_v26  ;;  %v354_v28 = vpop.f32.mrb[1].mxu1 }
 0x1c0   :  { %v197_v29 = vpop.f32.mrb[2].mxu1 }
 0x1c1   :  { %v200_v30 = vmax.f32 %v195_v27, 0.0  ;;  %v355_v31 = vpop.f32.mrb[3].mxu1 }
 0x1c3   :  { %v201_v32 = vpack.c.bf16 %v200_v30, %v200_v30 }
 0x1c5   :  { %365 = vmatmul.mubr.msk.bf16.vlgmr.msra.gmra.mrb[4].mxu0 %vm152_vm4, %v201_v32 }
 0x298   :  { %v277_v34 = vpop.f32.mrb[4].mxu0 }
 0x299   :  { %v278_v35 = vadd.f32 %v311_v33, %v277_v34  ;;  %v366_v36 = vpop.f32.mrb[5].mxu0 }
 0x29a   :  { %v280_v37 = vpop.f32.mrb[6].mxu0 }
 0x29b   :  { %v367_v38 = vpop.f32.mrb[7].mxu0  ;;  %284 = vst.msk [vmem:[#allocation2] sm:$0xff] %vm283_vm5, %v278_v35 }
 0x29c   :  { %394 = shalt.err (!%p391_p4)
}
 0x29d   :  { %s395_s6 = scalar_lea.hbm %s524_s7, 128 }
 0x29e   :  { %p396_p5 = scmp.ne.s32.totalorder %s524_s7, %s395_s6  ;;  %p399_p6 = scmp.lt.u32.totalorder %s395_s6, %s524_s7 }
 0x2a0   :  { %p401_p7 = pnand %p399_p6, %p396_p5 }
 0x2a2   :  { %404 = shalt.err (!%p401_p7)
}
 0x2a3   :  { %294 = dma.vmem_to_hbm [thread:$0]  %s292_s29, 128, %s524_s7, [#allocation3]  }
 0x2a4   :  { %405 = dma.done.wait [#allocation3], 128  }
 0x2a5   :  { %406 = vsyncadd [#allocation3], 4294967168 }
 0x2a6   :  { %298 = vsyncpa [#allocation3], 1 }

</bundles_post_ra>
